<compile_context>
chip_gen: v5e
topology: v5e:2x2
jax: 0.10.0
libtpu: 0.0.40
codegen_flags: <defaults>
</compile_context>

<pallas_src>
import jax
import jax.numpy as jnp
from jax import lax
from jax.experimental import pallas as pl
from jax.experimental.pallas import tpu as pltpu


# ------------------------------- helpers ------------------------------------

def _round_up(x, m):
  return (x + m - 1) // m * m


def _pad2(a, rows, cols, fill=0.0):
  out = jnp.full((rows, cols), fill, a.dtype)
  return out.at[: a.shape[0], : a.shape[1]].set(a)


def _batch_tiling(B):
  """Choose padded batch size and batch tile satisfying the (8,128) rule."""
  if B <= 128:
    B_pad = _round_up(max(B, 1), 8)
    return B_pad, B_pad, 1                       # single full-array tile
  B_pad = _round_up(B, 128)
  return B_pad, 128, B_pad // 128                # lane-dense 128-wide tiles


def _mosaic_params(arrays, out_bytes):
  total = sum(int(a.size) * a.dtype.itemsize for a in arrays) + int(out_bytes)
  limit = min(max(2 * total + (8 << 20), 32 << 20), 48 << 20)   # safe on v5e/v6e/v7x
  return pltpu.CompilerParams(
      dimension_semantics=("parallel",),
      vmem_limit_bytes=int(limit))


# ----------------------------- Pallas kernels -------------------------------

def _sender_kernel(x_ref, wi2h_ref, bi2h_ref, sos_ref, wih_ref, whh_ref,
                   brnn_ref, wemb_ref, bout_ref,
                   seq_ref, logp_ref, ent_ref):
  """Greedy roll-out of a single-layer tanh-RNNCell sender.

  hidden_to_output weight is tied to the embedding table wemb (V, E=H).
  Outputs are time-major: seq/logp/ent have shape (L, Bt).
  """
  B = x_ref.shape[0]
  V, E = wemb_ref.shape
  H = whh_ref.shape[1]
  L = seq_ref.shape[0]

  # loop-invariant loads / broadcasts, hoisted out of the serial recurrence
  w_ih = wih_ref[...]                               # (E, H) bf16
  w_hh = whh_ref[...]                               # (H, H) bf16
  w_emb = wemb_ref[...]                             # (V, E) bf16 (tied table)
  b_rnn = jnp.broadcast_to(brnn_ref[...], (B, H))   # (B, H) f32
  b_out = jnp.broadcast_to(bout_ref[...], (B, V))   # (B, V) f32 (pad cols = -1e30)
  iota_v = lax.broadcasted_iota(jnp.int32, (B, V), 1)

  # prev_hidden[0] = agent(sender_input)  (input2hidden modeled as Linear)
  h0 = jnp.dot(x_ref[...], wi2h_ref[...],
               preferred_element_type=jnp.float32) + bi2h_ref[...]
  inp0 = jnp.broadcast_to(sos_ref[...], (B, E)).astype(jnp.bfloat16)

  def step(t, carry):
    h, inp = carry                                  # h: (B,H) f32, inp: (B,E) bf16
    pre = (jnp.dot(inp, w_ih, preferred_element_type=jnp.float32)
           + jnp.dot(h.astype(jnp.bfloat16), w_hh,
                     preferred_element_type=jnp.float32)
           + b_rnn)
    h_new = jnp.tanh(pre)                           # (B, H) f32

    # tied hidden_to_output: logits = h_new @ w_emb.T + b   (contract last dims)
    logits = lax.dot_general(
        h_new.astype(jnp.bfloat16), w_emb,
        dimension_numbers=(((1,), (1,)), ((), ())),
        preferred_element_type=jnp.float32) + b_out          # (B, V) f32

    # softmax stats (f32); z's max entry is exactly 0 so pads underflow to exp=0
    m = jnp.max(logits, axis=-1, keepdims=True)
    z = logits - m
    e = jnp.exp(z)
    s = jnp.sum(e, axis=-1, keepdims=True)
    lse = jnp.log(s)                                # (B, 1)
    inv_s = pl.reciprocal(s, approx=True)
    ent = (lse - jnp.sum(e * z, axis=-1, keepdims=True) * inv_s)[:, 0]   # (B,)
    chosen_logp = -lse[:, 0]                        # log-prob of the greedy token

    # greedy argmax (first maximal index, like torch.argmax)
    is_max = logits >= m
    tok = jnp.min(jnp.where(is_max, iota_v, V), axis=-1).astype(jnp.int32)  # (B,)
    onehot = (iota_v == tok[:, None]).astype(jnp.bfloat16)                  # (B, V)

    # next-step input = embedding(tok) = onehot @ W_emb  (stays on the MXU)
    inp_new = jnp.dot(onehot, w_emb,
                      preferred_element_type=jnp.float32).astype(jnp.bfloat16)

    seq_ref[t] = tok
    logp_ref[t] = chosen_logp
    ent_ref[t] = ent
    return h_new, inp_new

  lax.fori_loop(0, L, step, (h0, inp0))


def _receiver_kernel(tmax_ref, emb_ref, len_ref, wih_ref, whh_ref, brnn_ref,
                     wout_ref, bout_ref, out_ref):
  """RnnEncoder (tanh RNN over the pre-embedded message, masked at per-example
  length, loop bounded by max(lengths)) followed by the hidden2output Linear."""
  T, B, E = emb_ref.shape
  H = whh_ref.shape[1]

  w_ih = wih_ref[...]                               # (E, H) bf16
  w_hh = whh_ref[...]                               # (H, H) bf16
  b_rnn = jnp.broadcast_to(brnn_ref[...], (B, H))   # (B, H) f32
  lens = len_ref[0, :]                              # (B,) int32

  h0 = jnp.zeros((B, H), jnp.float32)
  t_max = jnp.minimum(tmax_ref[0], T)               # dynamic bound (<= T)

  def step(t, h):
    emb_t = emb_ref[t]                              # (B, E) bf16
    h_new = jnp.tanh(jnp.dot(emb_t, w_ih, preferred_element_type=jnp.float32)
                     + jnp.dot(h.astype(jnp.bfloat16), w_hh,
                               preferred_element_type=jnp.float32)
                     + b_rnn)
    mask = (t < lens)[:, None]                      # (B, 1)
    return jnp.where(mask, h_new, h)

  h = lax.fori_loop(0, t_max, step, h0)
  out_ref[...] = jnp.dot(h.astype(jnp.bfloat16), wout_ref[...],
                         preferred_element_type=jnp.float32) + bout_ref[...]


# ----------------------------- wrappers (glue) -------------------------------

def sender_forward(params, sender_input):
  B, F = sender_input.shape
  V, E = params["w_emb"].shape
  H = params["w_hh_s"].shape[0]
  L = int(params["max_len"])

  F_pad = _round_up(F, 128)
  H_pad = _round_up(H, 128)
  E_pad = _round_up(E, 128)
  V_pad = _round_up(V, 128)
  B_pad, tb, nb = _batch_tiling(B)

  x_p = _pad2(sender_input.astype(jnp.float32), B_pad, F_pad)
  wi2h = _pad2(params["w_i2h"], F_pad, H_pad)
  bi2h = _pad2(params["b_i2h"], 1, H_pad)
  sos = _pad2(params["sos"], 1, E_pad)
  w_ih = _pad2(params["w_ih_s"], E_pad, H_pad).astype(jnp.bfloat16)
  w_hh = _pad2(params["w_hh_s"], H_pad, H_pad).astype(jnp.bfloat16)
  b_s = _pad2(params["b_s"], 1, H_pad)
  w_emb = _pad2(params["w_emb"], V_pad, E_pad).astype(jnp.bfloat16)
  # padded vocab columns get a huge negative bias so they never win argmax/softmax
  b_out = _pad2(params["b_out_vocab"], 1, V_pad, fill=-1e30)

  ins = (x_p, wi2h, bi2h, sos, w_ih, w_hh, b_s, w_emb, b_out)
  out_bytes = L * B_pad * (4 + 4 + 4)

  seq_t, logp_t, ent_t = pl.pallas_call(
      _sender_kernel,
      out_shape=(jax.ShapeDtypeStruct((L, B_pad), jnp.int32),
                 jax.ShapeDtypeStruct((L, B_pad), jnp.float32),
                 jax.ShapeDtypeStruct((L, B_pad), jnp.float32)),
      grid_spec=pltpu.PrefetchScalarGridSpec(
          num_scalar_prefetch=0,
          grid=(nb,),
          in_specs=[
              pl.BlockSpec((tb, F_pad), lambda b: (b, 0)),
              pl.BlockSpec((F_pad, H_pad), lambda b: (0, 0)),
              pl.BlockSpec((1, H_pad), lambda b: (0, 0)),
              pl.BlockSpec((1, E_pad), lambda b: (0, 0)),
              pl.BlockSpec((E_pad, H_pad), lambda b: (0, 0)),
              pl.BlockSpec((H_pad, H_pad), lambda b: (0, 0)),
              pl.BlockSpec((1, H_pad), lambda b: (0, 0)),
              pl.BlockSpec((V_pad, E_pad), lambda b: (0, 0)),
              pl.BlockSpec((1, V_pad), lambda b: (0, 0)),
          ],
          out_specs=(
              pl.BlockSpec((L, tb), lambda b: (0, b)),
              pl.BlockSpec((L, tb), lambda b: (0, b)),
              pl.BlockSpec((L, tb), lambda b: (0, b)),
          )),
      compiler_params=_mosaic_params(ins, out_bytes),
  )(*ins)

  sequence = seq_t[:, :B].T                              # (B, L)
  logprobs = logp_t[:, :B].T
  entropy = ent_t[:, :B].T
  zeros_i = jnp.zeros((B, 1), jnp.int32)
  zeros_f = jnp.zeros((B, 1), jnp.float32)
  sequence = jnp.concatenate([sequence, zeros_i], axis=1)   # forced EOS column
  logprobs = jnp.concatenate([logprobs, zeros_f], axis=1)
  entropy = jnp.concatenate([entropy, zeros_f], axis=1)
  return sequence, logprobs, entropy


def find_lengths(messages):
  # egg.core.util.find_lengths: index of first eos (token 0) + 1, clipped to T
  _, T = messages.shape
  zero_mask = (messages == 0)
  lengths = T - jnp.sum(jnp.cumsum(zero_mask, axis=1) > 0, axis=1)
  return jnp.minimum(lengths + 1, T).astype(jnp.int32)


def receiver_forward(params, message, lengths=None):
  B, T = message.shape
  V, E = params["w_emb"].shape
  H = params["w_hh_r"].shape[0]
  n_out = params["w_h2o"].shape[1]
  if lengths is None:
    lengths = find_lengths(message)
  lengths = lengths.astype(jnp.int32)

  E_pad = _round_up(E, 128)
  H_pad = _round_up(H, 128)
  O_pad = _round_up(n_out, 128)
  B_pad, tb, nb = _batch_tiling(B)

  # Pre-embed the message outside the kernel (cheap XLA gather over the tied table);
  # ship (T, B_pad, E_pad) bf16 instead of a (T, B, V) f32 one-hot.
  emb = jnp.take(params["w_emb"], message, axis=0)          # (B, T, E) f32
  emb = jnp.transpose(emb, (1, 0, 2)).astype(jnp.bfloat16)  # (T, B, E)
  emb = jnp.pad(emb, ((0, 0), (0, B_pad - B), (0, E_pad - E)))

  len_p = jnp.zeros((1, B_pad), jnp.int32).at[0, :B].set(lengths)
  t_max = jnp.max(lengths).reshape((1,)).astype(jnp.int32)   # scalar prefetch

  w_ih = _pad2(params["w_ih_r"], E_pad, H_pad).astype(jnp.bfloat16)
  w_hh = _pad2(params["w_hh_r"], H_pad, H_pad).astype(jnp.bfloat16)
  b_r = _pad2(params["b_r"], 1, H_pad)
  w_h2o = _pad2(params["w_h2o"], H_pad, O_pad).astype(jnp.bfloat16)
  b_h2o = _pad2(params["b_h2o"], 1, O_pad)

  ins = (emb, len_p, w_ih, w_hh, b_r, w_h2o, b_h2o)
  out_bytes = B_pad * O_pad * 4

  out = pl.pallas_call(
      _receiver_kernel,
      out_shape=jax.ShapeDtypeStruct((B_pad, O_pad), jnp.float32),
      grid_spec=pltpu.PrefetchScalarGridSpec(
          num_scalar_prefetch=1,
          grid=(nb,),
          in_specs=[
              pl.BlockSpec((T, tb, E_pad), lambda b, tm: (0, b, 0)),
              pl.BlockSpec((1, tb), lambda b, tm: (0, b)),
              pl.BlockSpec((E_pad, H_pad), lambda b, tm: (0, 0)),
              pl.BlockSpec((H_pad, H_pad), lambda b, tm: (0, 0)),
              pl.BlockSpec((1, H_pad), lambda b, tm: (0, 0)),
              pl.BlockSpec((H_pad, O_pad), lambda b, tm: (0, 0)),
              pl.BlockSpec((1, O_pad), lambda b, tm: (0, 0)),
          ],
          out_specs=pl.BlockSpec((tb, O_pad), lambda b, tm: (b, 0))),
      compiler_params=_mosaic_params(ins, out_bytes),
  )(t_max, *ins)

  out = out[:B, :n_out]
  logits = jnp.zeros((B,), jnp.float32)   # RnnReceiverDeterministic convention
  entropy = logits
  return out, logits, entropy


def tied_rnn_reinforce_forward(params, sender_input=None, aux_input=None,
                               message=None, receiver_input=None, lengths=None):
  """Mirrors TiedRnnReinforce.forward dispatch (aux/receiver inputs unused by the
  Linear agents).  NOTE: the original PyTorch code passes an undefined `length`;
  we accept `lengths` instead."""
  del aux_input, receiver_input
  if message is not None:
    return receiver_forward(params, message, lengths)
  assert sender_input is not None
  return sender_forward(params, sender_input)


# ----------------------------- parameter init --------------------------------

def init_params(key, n_features, n_outputs, vocab_size, embed_dim, hidden_size,
                max_len):
  assert embed_dim == hidden_size, "weight tying requires embed_dim == hidden_size"
  ks = jax.random.split(key, 12)

  def u(k, shape, scale):
    return jax.random.uniform(k, shape, jnp.float32, -scale, scale)

  s_h = 1.0 / float(hidden_size) ** 0.5
  s_f = 1.0 / float(n_features) ** 0.5
  s_e = 1.0 / float(embed_dim) ** 0.5
  return dict(
      max_len=max_len,
      # input2hidden agent: Linear(n_features, hidden)
      w_i2h=u(ks[0], (n_features, hidden_size), s_f),
      b_i2h=u(ks[1], (1, hidden_size), s_f),
      # shared tied embedding table (also hidden_to_output weight, receiver embedding)
      w_emb=jax.random.normal(ks[2], (vocab_size, embed_dim), jnp.float32),
      b_out_vocab=u(ks[3], (1, vocab_size), s_h),   # hidden_to_output bias (not tied)
      sos=jax.random.normal(ks[4], (1, embed_dim), jnp.float32),
      # sender RNNCell (biases combined)
      w_ih_s=u(ks[5], (embed_dim, hidden_size), s_h),
      w_hh_s=u(ks[6], (hidden_size, hidden_size), s_h),
      b_s=u(ks[7], (1, hidden_size), s_h),
      # receiver nn.RNN (biases combined)
      w_ih_r=u(ks[8], (embed_dim, hidden_size), s_h),
      w_hh_r=u(ks[9], (hidden_size, hidden_size), s_h),
      b_r=u(ks[10], (1, hidden_size), s_h),
      # hidden2output agent: Linear(hidden, n_outputs)
      w_h2o=u(ks[11], (hidden_size, n_outputs), s_e),
      b_h2o=jnp.zeros((1, n_outputs), jnp.float32),
  )


if __name__ == "__main__":
  key = jax.random.PRNGKey(0)
  B, F_in, V, E, H, L, n_out = 2, 16, 8, 32, 32, 8, 16
  pkey, xkey = jax.random.split(key)
  params = init_params(pkey, F_in, n_out, V, E, H, L)
  sender_input = jax.random.normal(xkey, (B, F_in), jnp.float32)

  # generative (sender) path: message is None
  seq, logp, ent = tied_rnn_reinforce_forward(params, sender_input=sender_input)
  jax.block_until_ready((seq, logp, ent))
  assert seq.shape == (B, L + 1) and logp.shape == (B, L + 1) and ent.shape == (B, L + 1)

  # discriminative (receiver) path: message provided
  out, rlog, rent = tied_rnn_reinforce_forward(params, message=seq)
  jax.block_until_ready((out, rlog, rent))
  assert out.shape == (B, n_out) and rlog.shape == (B,) and rent.shape == (B,)

  print("KERNEL_OK")
</pallas_src>

<mosaic_0001>
module attributes {stable_mosaic.version = 11 : i64} {
  func.func @_sender_kernel(%arg0: i32, %arg1: memref<8x128xf32, #tpu.memory_space<vmem>>, %arg2: memref<128x128xf32, #tpu.memory_space<vmem>>, %arg3: memref<1x128xf32, #tpu.memory_space<vmem>>, %arg4: memref<1x128xf32, #tpu.memory_space<vmem>>, %arg5: memref<128x128xbf16, #tpu.memory_space<vmem>>, %arg6: memref<128x128xbf16, #tpu.memory_space<vmem>>, %arg7: memref<1x128xf32, #tpu.memory_space<vmem>>, %arg8: memref<128x128xbf16, #tpu.memory_space<vmem>>, %arg9: memref<1x128xf32, #tpu.memory_space<vmem>>, %arg10: memref<8x8xi32, #tpu.memory_space<vmem>>, %arg11: memref<8x8xf32, #tpu.memory_space<vmem>>, %arg12: memref<8x8xf32, #tpu.memory_space<vmem>>) attributes {dimension_semantics = [#tpu.dimension_semantics<parallel>], iteration_bounds = array<i64: 1>, scalar_prefetch = 0 : i64, scratch_operands = 0 : i64, tpu.core_type = #tpu.core_type<tc>, window_params = [{transform_indices = @transform_0, window_bounds = array<i64: 8, 128>}, {pipeline_mode = #tpu.pipeline_mode<synchronous>, transform_indices = @transform_1, window_bounds = array<i64: 128, 128>}, {pipeline_mode = #tpu.pipeline_mode<synchronous>, transform_indices = @transform_2, window_bounds = array<i64: 1, 128>}, {pipeline_mode = #tpu.pipeline_mode<synchronous>, transform_indices = @transform_3, window_bounds = array<i64: 1, 128>}, {pipeline_mode = #tpu.pipeline_mode<synchronous>, transform_indices = @transform_4, window_bounds = array<i64: 128, 128>}, {pipeline_mode = #tpu.pipeline_mode<synchronous>, transform_indices = @transform_5, window_bounds = array<i64: 128, 128>}, {pipeline_mode = #tpu.pipeline_mode<synchronous>, transform_indices = @transform_6, window_bounds = array<i64: 1, 128>}, {pipeline_mode = #tpu.pipeline_mode<synchronous>, transform_indices = @transform_7, window_bounds = array<i64: 128, 128>}, {pipeline_mode = #tpu.pipeline_mode<synchronous>, transform_indices = @transform_8, window_bounds = array<i64: 1, 128>}, {transform_indices = @transform_9, window_bounds = array<i64: 8, 8>}, {transform_indices = @transform_10, window_bounds = array<i64: 8, 8>}, {transform_indices = @transform_11, window_bounds = array<i64: 8, 8>}]} {
    %c0 = arith.constant 0 : index
    %c0_0 = arith.constant 0 : index
    %0 = vector.load %arg5[%c0, %c0_0] : memref<128x128xbf16, #tpu.memory_space<vmem>>, vector<128x128xbf16>
    %c0_1 = arith.constant 0 : index
    %c0_2 = arith.constant 0 : index
    %1 = vector.load %arg6[%c0_1, %c0_2] : memref<128x128xbf16, #tpu.memory_space<vmem>>, vector<128x128xbf16>
    %c0_3 = arith.constant 0 : index
    %c0_4 = arith.constant 0 : index
    %2 = vector.load %arg8[%c0_3, %c0_4] : memref<128x128xbf16, #tpu.memory_space<vmem>>, vector<128x128xbf16>
    %c0_5 = arith.constant 0 : index
    %c0_6 = arith.constant 0 : index
    %3 = vector.load %arg7[%c0_5, %c0_6] : memref<1x128xf32, #tpu.memory_space<vmem>>, vector<1x128xf32>
    %4 = vector.shape_cast %3 : vector<1x128xf32> to vector<1x128xf32>
    %5 = vector.broadcast %4 : vector<1x128xf32> to vector<8x128xf32>
    %c0_7 = arith.constant 0 : index
    %c0_8 = arith.constant 0 : index
    %6 = vector.load %arg9[%c0_7, %c0_8] : memref<1x128xf32, #tpu.memory_space<vmem>>, vector<1x128xf32>
    %7 = vector.shape_cast %6 : vector<1x128xf32> to vector<1x128xf32>
    %8 = vector.broadcast %7 : vector<1x128xf32> to vector<8x128xf32>
    %9 = tpu.iota {dimensions = array<i32: 1>} : vector<8x128xi32>
    %c0_9 = arith.constant 0 : index
    %c0_10 = arith.constant 0 : index
    %10 = vector.load %arg1[%c0_9, %c0_10] : memref<8x128xf32, #tpu.memory_space<vmem>>, vector<8x128xf32>
    %c0_11 = arith.constant 0 : index
    %c0_12 = arith.constant 0 : index
    %11 = vector.load %arg2[%c0_11, %c0_12] : memref<128x128xf32, #tpu.memory_space<vmem>>, vector<128x128xf32>
    %cst = arith.constant dense<0.000000e+00> : vector<8x128xf32>
    %12 = tpu.matmul %10, %11, %cst {dimension_numbers = #tpu.dot_dimension_numbers<[1], [0], [0], [1], [0, 0, 1, 1], [], []>} : vector<8x128xf32>, vector<128x128xf32>, vector<8x128xf32> -> vector<8x128xf32>
    %c0_13 = arith.constant 0 : index
    %c0_14 = arith.constant 0 : index
    %13 = vector.load %arg3[%c0_13, %c0_14] : memref<1x128xf32, #tpu.memory_space<vmem>>, vector<1x128xf32>
    %14 = vector.broadcast %13 : vector<1x128xf32> to vector<8x128xf32>
    %15 = arith.addf %12, %14 : vector<8x128xf32>
    %c0_15 = arith.constant 0 : index
    %c0_16 = arith.constant 0 : index
    %16 = vector.load %arg4[%c0_15, %c0_16] : memref<1x128xf32, #tpu.memory_space<vmem>>, vector<1x128xf32>
    %17 = vector.shape_cast %16 : vector<1x128xf32> to vector<1x128xf32>
    %18 = vector.broadcast %17 : vector<1x128xf32> to vector<8x128xf32>
    %19 = arith.truncf %18 : vector<8x128xf32> to vector<8x128xbf16>
    %c0_i32 = arith.constant 0 : i32
    %c8_i32 = arith.constant 8 : i32
    %20 = arith.addi %c0_i32, %c8_i32 : i32
    %c1_i32 = arith.constant 1 : i32
    %21:2 = scf.for %arg13 = %c0_i32 to %20 step %c1_i32 iter_args(%arg14 = %15, %arg15 = %19) -> (vector<8x128xf32>, vector<8x128xbf16>)  : i32 {
      %cst_18 = arith.constant dense<0.000000e+00> : vector<8x128xf32>
      %22 = tpu.matmul %arg15, %0, %cst_18 {dimension_numbers = #tpu.dot_dimension_numbers<[1], [0], [0], [1], [0, 0, 1, 1], [], []>} : vector<8x128xbf16>, vector<128x128xbf16>, vector<8x128xf32> -> vector<8x128xf32>
      %23 = arith.truncf %arg14 : vector<8x128xf32> to vector<8x128xbf16>
      %cst_19 = arith.constant dense<0.000000e+00> : vector<8x128xf32>
      %24 = tpu.matmul %23, %1, %cst_19 {dimension_numbers = #tpu.dot_dimension_numbers<[1], [0], [0], [1], [0, 0, 1, 1], [], []>} : vector<8x128xbf16>, vector<128x128xbf16>, vector<8x128xf32> -> vector<8x128xf32>
      %25 = arith.addf %22, %24 : vector<8x128xf32>
      %26 = arith.addf %25, %5 : vector<8x128xf32>
      %27 = math.tanh %26 : vector<8x128xf32>
      %28 = arith.truncf %27 : vector<8x128xf32> to vector<8x128xbf16>
      %cst_20 = arith.constant dense<0.000000e+00> : vector<8x128xf32>
      %29 = tpu.matmul %28, %2, %cst_20 {dimension_numbers = #tpu.dot_dimension_numbers<[1], [1], [0], [0], [0, 0, 1, 0], [], []>} : vector<8x128xbf16>, vector<128x128xbf16>, vector<8x128xf32> -> vector<8x128xf32>
      %30 = arith.addf %29, %8 : vector<8x128xf32>
      %cst_21 = arith.constant dense<0xFF800000> : vector<8xf32>
      %31 = vector.multi_reduction <maximumf>, %30, %cst_21 [1] : vector<8x128xf32> to vector<8xf32>
      %32 = vector.shape_cast %31 : vector<8xf32> to vector<8x1xf32>
      %33 = vector.broadcast %32 : vector<8x1xf32> to vector<8x128xf32>
      %34 = arith.subf %30, %33 : vector<8x128xf32>
      %35 = math.exp %34 : vector<8x128xf32>
      %cst_22 = arith.constant dense<0.000000e+00> : vector<8xf32>
      %36 = vector.multi_reduction <add>, %35, %cst_22 [1] : vector<8x128xf32> to vector<8xf32>
      %37 = vector.shape_cast %36 : vector<8xf32> to vector<8x1xf32>
      %38 = math.log %37 : vector<8x1xf32>
      %39 = tpu.reciprocal %37 {approx = true} : vector<8x1xf32> -> vector<8x1xf32>
      %40 = arith.mulf %35, %34 : vector<8x128xf32>
      %cst_23 = arith.constant dense<0.000000e+00> : vector<8xf32>
      %41 = vector.multi_reduction <add>, %40, %cst_23 [1] : vector<8x128xf32> to vector<8xf32>
      %42 = vector.shape_cast %41 : vector<8xf32> to vector<8x1xf32>
      %43 = arith.mulf %42, %39 : vector<8x1xf32>
      %44 = arith.subf %38, %43 : vector<8x1xf32>
      %45 = vector.shape_cast %44 : vector<8x1xf32> to vector<8xf32>
      %46 = vector.shape_cast %38 : vector<8x1xf32> to vector<8xf32>
      %cst_24 = arith.constant 0.000000e+00 : f32
      %47 = vector.broadcast %cst_24 : f32 to vector<8xf32>
      %48 = arith.subf %47, %46 : vector<8xf32>
      %49 = vector.broadcast %32 : vector<8x1xf32> to vector<8x128xf32>
      %50 = arith.cmpf oge, %30, %49 : vector<8x128xf32>
      %c128_i32 = arith.constant 128 : i32
      %51 = vector.broadcast %c128_i32 : i32 to vector<8x128xi32>
      %52 = arith.select %50, %9, %51 : vector<8x128xi1>, vector<8x128xi32>
      %cst_25 = arith.constant dense<2147483647> : vector<8xi32>
      %53 = vector.multi_reduction <minsi>, %52, %cst_25 [1] : vector<8x128xi32> to vector<8xi32>
      %54 = vector.shape_cast %53 : vector<8xi32> to vector<8x1xi32>
      %55 = vector.broadcast %54 : vector<8x1xi32> to vector<8x128xi32>
      %56 = arith.cmpi eq, %9, %55 : vector<8x128xi32>
      %57 = arith.extui %56 : vector<8x128xi1> to vector<8x128xi32>
      %58 = arith.sitofp %57 : vector<8x128xi32> to vector<8x128xf32>
      %59 = arith.truncf %58 : vector<8x128xf32> to vector<8x128xbf16>
      %cst_26 = arith.constant dense<0.000000e+00> : vector<8x128xf32>
      %60 = tpu.matmul %59, %2, %cst_26 {dimension_numbers = #tpu.dot_dimension_numbers<[1], [0], [0], [1], [0, 0, 1, 1], [], []>} : vector<8x128xbf16>, vector<128x128xbf16>, vector<8x128xf32> -> vector<8x128xf32>
      %61 = arith.truncf %60 : vector<8x128xf32> to vector<8x128xbf16>
      %62 = arith.index_cast %arg13 : i32 to index
      %c0_27 = arith.constant 0 : index
      %63 = vector.load %arg10[%62, %c0_27] : memref<8x8xi32, #tpu.memory_space<vmem>>, vector<1x8xi32>
      %64 = vector.shape_cast %63 : vector<1x8xi32> to vector<8xi32>
      %65 = vector.shape_cast %53 : vector<8xi32> to vector<1x8xi32>
      tpu.vector_store %arg10[%62, %c0_27], %65 {strides = array<i32>} : memref<8x8xi32, #tpu.memory_space<vmem>>, vector<1x8xi32>,
      %66 = arith.index_cast %arg13 : i32 to index
      %c0_28 = arith.constant 0 : index
      %67 = vector.load %arg11[%66, %c0_28] : memref<8x8xf32, #tpu.memory_space<vmem>>, vector<1x8xf32>
      %68 = vector.shape_cast %67 : vector<1x8xf32> to vector<8xf32>
      %69 = vector.shape_cast %48 : vector<8xf32> to vector<1x8xf32>
      tpu.vector_store %arg11[%66, %c0_28], %69 {strides = array<i32>} : memref<8x8xf32, #tpu.memory_space<vmem>>, vector<1x8xf32>,
      %70 = arith.index_cast %arg13 : i32 to index
      %c0_29 = arith.constant 0 : index
      %71 = vector.load %arg12[%70, %c0_29] : memref<8x8xf32, #tpu.memory_space<vmem>>, vector<1x8xf32>
      %72 = vector.shape_cast %71 : vector<1x8xf32> to vector<8xf32>
      %73 = vector.shape_cast %45 : vector<8xf32> to vector<1x8xf32>
      tpu.vector_store %arg12[%70, %c0_29], %73 {strides = array<i32>} : memref<8x8xf32, #tpu.memory_space<vmem>>, vector<1x8xf32>,
      scf.yield %27, %61 : vector<8x128xf32>, vector<8x128xbf16>
    }
    %c8_i32_17 = arith.constant 8 : i32
    return
  }
  func.func @transform_0(%arg0: i32) -> (i32, i32) {
    %c0_i32 = arith.constant 0 : i32
    %c0_i32_0 = arith.constant 0 : i32
    return %arg0, %c0_i32 : i32, i32
  }
  func.func @transform_1(%arg0: i32) -> (i32, i32) {
    %c0_i32 = arith.constant 0 : i32
    %c0_i32_0 = arith.constant 0 : i32
    %c0_i32_1 = arith.constant 0 : i32
    return %c0_i32, %c0_i32_0 : i32, i32
  }
  func.func @transform_2(%arg0: i32) -> (i32, i32) {
    %c0_i32 = arith.constant 0 : i32
    %c0_i32_0 = arith.constant 0 : i32
    %c0_i32_1 = arith.constant 0 : i32
    return %c0_i32, %c0_i32_0 : i32, i32
  }
  func.func @transform_3(%arg0: i32) -> (i32, i32) {
    %c0_i32 = arith.constant 0 : i32
    %c0_i32_0 = arith.constant 0 : i32
    %c0_i32_1 = arith.constant 0 : i32
    return %c0_i32, %c0_i32_0 : i32, i32
  }
  func.func @transform_4(%arg0: i32) -> (i32, i32) {
    %c0_i32 = arith.constant 0 : i32
    %c0_i32_0 = arith.constant 0 : i32
    %c0_i32_1 = arith.constant 0 : i32
    return %c0_i32, %c0_i32_0 : i32, i32
  }
  func.func @transform_5(%arg0: i32) -> (i32, i32) {
    %c0_i32 = arith.constant 0 : i32
    %c0_i32_0 = arith.constant 0 : i32
    %c0_i32_1 = arith.constant 0 : i32
    return %c0_i32, %c0_i32_0 : i32, i32
  }
  func.func @transform_6(%arg0: i32) -> (i32, i32) {
    %c0_i32 = arith.constant 0 : i32
    %c0_i32_0 = arith.constant 0 : i32
    %c0_i32_1 = arith.constant 0 : i32
    return %c0_i32, %c0_i32_0 : i32, i32
  }
  func.func @transform_7(%arg0: i32) -> (i32, i32) {
    %c0_i32 = arith.constant 0 : i32
    %c0_i32_0 = arith.constant 0 : i32
    %c0_i32_1 = arith.constant 0 : i32
    return %c0_i32, %c0_i32_0 : i32, i32
  }
  func.func @transform_8(%arg0: i32) -> (i32, i32) {
    %c0_i32 = arith.constant 0 : i32
    %c0_i32_0 = arith.constant 0 : i32
    %c0_i32_1 = arith.constant 0 : i32
    return %c0_i32, %c0_i32_0 : i32, i32
  }
  func.func @transform_9(%arg0: i32) -> (i32, i32) {
    %c0_i32 = arith.constant 0 : i32
    %c0_i32_0 = arith.constant 0 : i32
    return %c0_i32, %arg0 : i32, i32
  }
  func.func @transform_10(%arg0: i32) -> (i32, i32) {
    %c0_i32 = arith.constant 0 : i32
    %c0_i32_0 = arith.constant 0 : i32
    return %c0_i32, %arg0 : i32, i32
  }
  func.func @transform_11(%arg0: i32) -> (i32, i32) {
    %c0_i32 = arith.constant 0 : i32
    %c0_i32_0 = arith.constant 0 : i32
    return %c0_i32, %arg0 : i32, i32
  }
}

</mosaic_0001>

<bundles_post_ra>
// kernel: tpu_custom_call.1
= control target key start
LH: loop header
LB: loop body
LE: loop exit
PB: predicated region body
PF: predicated region fallthrough
CT: control target
= control target key end

     0   :  { %17 = vsyncpa [#allocation3], 0  ;;  %s1228_s0 = inlined_call_operand.hbm [shape: f32[8,128], index: 0, kind: input, shape index: {}]   ;;  %s1229_s1 = inlined_call_operand.hbm [shape: f32[128,128], index: 1, kind: input, shape index: {}]   ;;  %s1230_s2 = inlined_call_operand.vmem [shape: f32[1,128], index: 2, kind: input, shape index: {}]   ;;  %s1231_s3 = inlined_call_operand.vmem [shape: f32[1,128], index: 3, kind: input, shape index: {}]   ;;  %s1232_s4 = inlined_call_operand.hbm [shape: bf16[128,128], index: 4, kind: input, shape index: {}]   ;;  %s1233_s5 = inlined_call_operand.hbm [shape: bf16[128,128], index: 5, kind: input, shape index: {}]   ;;  %s1234_s6 = inlined_call_operand.vmem [shape: f32[1,128], index: 6, kind: input, shape index: {}]   ;;  %s1235_s7 = inlined_call_operand.hbm [shape: bf16[128,128], index: 7, kind: input, shape index: {}]   ;;  %s1236_s8 = inlined_call_operand.vmem [shape: f32[1,128], index: 8, kind: input, shape index: {}]   ;;  %s1237_s9 = inlined_call_operand.hbm [shape: s32[8,8], index: 9, kind: output, shape index: {0}]   ;;  %s1238_s10 = inlined_call_operand.hbm [shape: f32[8,8], index: 10, kind: output, shape index: {1}]   ;;  %s1239_s11 = inlined_call_operand.hbm [shape: f32[8,8], index: 11, kind: output, shape index: {2}]  }
   0x1   :  { %18 = vsyncpa [#allocation6], 0 }
   0x2   :  { %19 = vsyncpa [#allocation9], 0 }
   0x3   :  { %20 = vsyncpa [#allocation4], 0  ;;  %s37_s19 = sshll.u32 %s1229_s1, 4  ;;  %s38_s19 = int_to_ptr.hbm [resolvable:$true] %s37_s19 }
   0x4   :  { %21 = vsyncpa [#allocation13], 0  ;;  %s938_s20 = smov [#allocation5]   ;;  %s939_s22 = smov 128  }
   0x5   :  { %s39_s21 = sshll.u32 %s938_s20, 4  ;;  %s940_s23 = smov 8   ;;  %s40_s21 = int_to_ptr.vmem [resolvable:$true] %s39_s21 }
   0x6   :  { %45 = dma.hbm_to_vmem [thread:$0]  %s38_s19, 2048, %s40_s21, [#allocation6], %s939_s22, %s939_s22, %s940_s23  }
   0x7   :  { %s67_s26 = sshll.u32 %s1233_s5, 4  ;;  %s941_s27 = smov [#allocation8]   ;;  %s68_s26 = int_to_ptr.hbm [resolvable:$true] %s67_s26 }
   0x8   :  { %s69_s28 = sshll.u32 %s941_s27, 4  ;;  %s27_s12 = sshll.u32 %s1228_s0, 4  ;;  %s70_s28 = int_to_ptr.vmem [resolvable:$true] %s69_s28  ;;  %s28_s12 = int_to_ptr.hbm [resolvable:$true] %s27_s12 }
   0x9   :  { %s942_s1 = smov 64   ;;  %s943_s13 = smov 4  }
   0xa   :  { %75 = dma.hbm_to_vmem [thread:$0]  %s68_s26, 1024, %s70_s28, [#allocation9], %s942_s1, %s942_s1, %s943_s13  }
   0xb   :  { %s54_s16 = sshll.u32 %s1232_s4, 4  ;;  %s944_s17 = smov [#allocation2]   ;;  %s55_s16 = int_to_ptr.hbm [resolvable:$true] %s54_s16 }
   0xc   :  { %s29_s18 = sshll.u32 %s944_s17, 4  ;;  %s945_s5 = smov [#allocation7]   ;;  %s30_s18 = int_to_ptr.vmem [resolvable:$true] %s29_s18 }
   0xd   :  { %32 = dma.hbm_to_vmem [thread:$0]  %s28_s12, 128, %s30_s18, [#allocation3]  }
   0xe   :  { %s56_s19 = sshll.u32 %s945_s5, 4  ;;  %s82_s0 = sshll.u32 %s1235_s7, 4  ;;  %s57_s19 = int_to_ptr.vmem [resolvable:$true] %s56_s19  ;;  %s83_s0 = int_to_ptr.hbm [resolvable:$true] %s82_s0 }
   0xf   :  { %62 = dma.hbm_to_vmem [thread:$0]  %s55_s16, 1024, %s57_s19, [#allocation6], %s942_s1, %s942_s1, %s943_s13  }
  0x10   :  { %s946_s22 = smov [#allocation10]  }
  0x11   :  { %s84_s23 = sshll.u32 %s946_s22, 4  ;;  %s85_s23 = int_to_ptr.vmem [resolvable:$true] %s84_s23 }
  0x12   :  { %90 = dma.hbm_to_vmem [thread:$0]  %s83_s0, 1024, %s85_s23, [#allocation9], %s942_s1, %s942_s1, %s943_s13  }
  0x13   :  { %916 = dma.done.wait [#allocation3], 128  }
  0x14   :  { %917 = vsyncadd [#allocation3], 4294967168 }
  0x15   :  { %918 = dma.done.wait [#allocation6], 3072  }
  0x16   :  { %919 = vsyncadd [#allocation6], 4294964224 }
  0x17   :  { %920 = dma.done.wait [#allocation9], 2048  }
  0x18   :  { %921 = vsyncadd [#allocation9], 4294965248  ;;  %v169_v0 = vlaneseq  ;;  %v1028_v2 = vld [vmem:[#allocation7] sm:$0xf]  ;;  %v1030_v3 = vld [vmem:[#allocation7] sm:$0xf0] }
  0x19   :  { %1240 = vst [vmem:[#allocation20_spill] sm:$0xff] %v1028_v2  ;;  %v1032_v4 = vld [vmem:[#allocation7 + $0x8] sm:$0xf]  ;;  %v1034_v5 = vld [vmem:[#allocation7 + $0x8] sm:$0xf0]  ;;  %v187_v53 = vld [vmem:[#allocation5 + $0x78] sm:$0xff] }
  0x1a   :  { %v1026_v1 = vand.u32 127, %v169_v0  ;;  %1241 = vst [vmem:[#allocation21_spill] sm:$0xff] %v1030_v3  ;;  %v1036_v6 = vld [vmem:[#allocation7 + $0x10] sm:$0xf]  ;;  %v1038_v7 = vld [vmem:[#allocation7 + $0x10] sm:$0xf0]  ;;  %192 = vmatpush.msra.mxu0 %v187_v53 }
  0x1b   :  { %1242 = vst [vmem:[#allocation22_spill] sm:$0xff] %v1032_v4  ;;  %v1040_v8 = vld [vmem:[#allocation7 + $0x18] sm:$0xf]  ;;  %v1042_v9 = vld [vmem:[#allocation7 + $0x18] sm:$0xf0]  ;;  %v186_v54 = vld [vmem:[#allocation5 + $0x70] sm:$0xff] }
  0x1c   :  { %1243 = vst [vmem:[#allocation23_spill] sm:$0xff] %v1034_v5  ;;  %v1044_v10 = vld [vmem:[#allocation7 + $0x20] sm:$0xf]  ;;  %v1046_v11 = vld [vmem:[#allocation7 + $0x20] sm:$0xf0]  ;;  %v185_v56 = vld [vmem:[#allocation5 + $0x68] sm:$0xff]  ;;  %193 = vmatpush.msra.mxu0 %v186_v54 }
  0x1d   :  { %v1048_v12 = vld [vmem:[#allocation7 + $0x28] sm:$0xf]  ;;  %v1050_v13 = vld [vmem:[#allocation7 + $0x28] sm:$0xf0]  ;;  %v1052_v14 = vld [vmem:[#allocation7 + $0x30] sm:$0xf] }
  0x1e   :  { %v1054_v15 = vld [vmem:[#allocation7 + $0x30] sm:$0xf0]  ;;  %v1056_v16 = vld [vmem:[#allocation7 + $0x38] sm:$0xf]  ;;  %v1058_v17 = vld [vmem:[#allocation7 + $0x38] sm:$0xf0]  ;;  %194 = vmatpush.msra.mxu0 %v185_v56 }
  0x1f   :  { %v1060_v18 = vld [vmem:[#allocation8] sm:$0xf]  ;;  %v1062_v19 = vld [vmem:[#allocation8] sm:$0xf0]  ;;  %v1064_v20 = vld [vmem:[#allocation8 + $0x8] sm:$0xf] }
  0x20   :  { %v1066_v21 = vld [vmem:[#allocation8 + $0x8] sm:$0xf0]  ;;  %v1068_v22 = vld [vmem:[#allocation8 + $0x10] sm:$0xf]  ;;  %v1070_v23 = vld [vmem:[#allocation8 + $0x10] sm:$0xf0] }
  0x21   :  { %v1072_v24 = vld [vmem:[#allocation8 + $0x18] sm:$0xf]  ;;  %v1074_v25 = vld [vmem:[#allocation8 + $0x18] sm:$0xf0]  ;;  %v1076_v26 = vld [vmem:[#allocation8 + $0x20] sm:$0xf] }
  0x22   :  { %v1078_v27 = vld [vmem:[#allocation8 + $0x20] sm:$0xf0]  ;;  %v1080_v28 = vld [vmem:[#allocation8 + $0x28] sm:$0xf]  ;;  %v1082_v29 = vld [vmem:[#allocation8 + $0x28] sm:$0xf0] }
  0x23   :  { %v1084_v30 = vld [vmem:[#allocation8 + $0x30] sm:$0xf]  ;;  %v1086_v31 = vld [vmem:[#allocation8 + $0x30] sm:$0xf0]  ;;  %v1088_v32 = vld [vmem:[#allocation8 + $0x38] sm:$0xf] }
  0x24   :  { %v1090_v33 = vld [vmem:[#allocation8 + $0x38] sm:$0xf0]  ;;  %v1092_v34 = vld [vmem:[#allocation10] sm:$0xf]  ;;  %v1094_v35 = vld [vmem:[#allocation10] sm:$0xf0] }
  0x25   :  { %v1096_v36 = vld [vmem:[#allocation10 + $0x8] sm:$0xf]  ;;  %v1098_v37 = vld [vmem:[#allocation10 + $0x8] sm:$0xf0]  ;;  %v1100_v38 = vld [vmem:[#allocation10 + $0x10] sm:$0xf] }
  0x26   :  { %v1102_v39 = vld [vmem:[#allocation10 + $0x10] sm:$0xf0]  ;;  %v1104_v40 = vld [vmem:[#allocation10 + $0x18] sm:$0xf]  ;;  %v1106_v41 = vld [vmem:[#allocation10 + $0x18] sm:$0xf0] }
  0x27   :  { %v1108_v42 = vld [vmem:[#allocation10 + $0x20] sm:$0xf]  ;;  %v1110_v43 = vld [vmem:[#allocation10 + $0x20] sm:$0xf0]  ;;  %v1112_v44 = vld [vmem:[#allocation10 + $0x28] sm:$0xf] }
  0x28   :  { %v1114_v45 = vld [vmem:[#allocation10 + $0x28] sm:$0xf0]  ;;  %v1116_v46 = vld [vmem:[#allocation10 + $0x30] sm:$0xf]  ;;  %v1118_v47 = vld [vmem:[#allocation10 + $0x30] sm:$0xf0] }
  0x29   :  { %v1120_v48 = vld [vmem:[#allocation10 + $0x38] sm:$0xf]  ;;  %v1122_v49 = vld [vmem:[#allocation10 + $0x38] sm:$0xf0]  ;;  %v184_v57 = vld [vmem:[#allocation5 + $0x60] sm:$0xff] }
  0x2a   :  { %v1127_v50 = vld [vmem:[%s1234_s6] ss:$0 sm:$0xff]  ;;  %195 = vmatpush.msra.mxu0 %v184_v57  ;;  %v182_v59 = vld [vmem:[#allocation5 + $0x50] sm:$0xff]  ;;  %v181_v60 = vld [vmem:[#allocation5 + $0x48] sm:$0xff] }
  0x2b   :  { %v1132_v51 = vld [vmem:[%s1236_s8] ss:$0 sm:$0xff]  ;;  %v180_v61 = vld [vmem:[#allocation5 + $0x40] sm:$0xff]  ;;  %v178_v63 = vld [vmem:[#allocation5 + $0x30] sm:$0xff]  ;;  %s1144_s8 = smov 0  }
  0x2c   :  { %v702_v52 = vld [vmem:[%s1231_s3] ss:$0 sm:$0xff]  ;;  %v177_v0 = vld [vmem:[#allocation5 + $0x28] sm:$0xff]  ;;  %v174_v54 = vld [vmem:[#allocation5 + $0x10] sm:$0xff] }
  0x2d   :  { %v216_v55 = vpack.c.bf16 %v702_v52, %v702_v52   ;;  %v183_v58 = vld [vmem:[#allocation5 + $0x58] sm:$0xff]  ;;  %v176_v52 = vld [vmem:[#allocation5 + $0x20] sm:$0xff]  ;;  %v173_v56 = vld [vmem:[#allocation5 + $0x8] sm:$0xff] }
  0x2e   :  { %196 = vmatpush.msra.mxu0 %v183_v58  ;;  %v179_v62 = vld [vmem:[#allocation5 + $0x38] sm:$0xff]  ;;  %v172_v57 = vld [vmem:[#allocation5] sm:$0xff] }
  0x2f   :  { %v175_v53 = vld [vmem:[#allocation5 + $0x18] sm:$0xff] }
  0x30   :  { %197 = vmatpush.msra.mxu0 %v182_v59  ;;  %v171_v58 = vld [vmem:[#allocation2] sm:$0xff] }
  0x31   :  { %v703_v59 = vld [vmem:[%s1230_s2] ss:$0 sm:$0xff] }
  0x32   :  { %198 = vmatpush.msra.mxu0 %v181_v60 }
  0x34   :  { %199 = vmatpush.msra.mxu0 %v180_v61 }
  0x36   :  { %200 = vmatpush.msra.mxu0 %v179_v62 }
  0x38   :  { %201 = vmatpush.msra.mxu0 %v178_v63 }
  0x3a   :  { %202 = vmatpush.msra.mxu0 %v177_v0 }
  0x3c   :  { %203 = vmatpush.msra.mxu0 %v176_v52 }
  0x3e   :  { %204 = vmatpush.msra.mxu0 %v175_v53 }
  0x40   :  { %205 = vmatpush.msra.mxu0 %v174_v54 }
  0x42   :  { %206 = vmatpush.msra.mxu0 %v173_v56 }
  0x44   :  { %207 = vmatpush.msra.mxu0 %v172_v57 }
  0x45   :  { %208 = vmatmul.f32.vlgmr.msra.gmra.mxu0 %v171_v58 }
  0xc2   :  { %v209_v60 = vpop.f32.mrf.mxu0 }
  0xc3   :  { %v210_v61 = vadd.f32 %v703_v59, %v209_v60  }
  0xc4 LB: > { %v571_v62 = vor.u32 %v1090_v33, %v1088_v32  ;;  %v603_v63 = vor.u32 %v1058_v17, %v1056_v16  ;;  %v567_v0 = vor.u32 %v1086_v31, %v1084_v30  ;;  %v599_v52 = vor.u32 %v1054_v15, %v1052_v14  ;;  %v1244_v4 = vld [vmem:[#allocation22_spill] sm:$0xff]  ;;  %v1245_v5 = vld [vmem:[#allocation23_spill] sm:$0xff]  ;;  %v1246_v2 = vld [vmem:[#allocation20_spill] sm:$0xff]  ;;  %s463_s2 = scalar_lea.vmem [#allocation11], %s936_s8  ;;  %s469_s28 = scalar_lea.vmem [#allocation12], %s936_s8  ;;  %s936_s8 = sphi %s1144_s8, %s222_s8   ;;  %v932_v61 = vphi %v210_v61, %v705_v61   ;;  %v928_v55 = vphi %v216_v55, %v461_v55  }
  0xc5   : > { %v635_v53 = vor.u32 %v1122_v49, %v1120_v48  ;;  %v563_v54 = vor.u32 %v1082_v29, %v1080_v28  ;;  %v595_v56 = vor.u32 %v1050_v13, %v1048_v12  ;;  %v631_v57 = vor.u32 %v1118_v47, %v1116_v46  ;;  %v1247_v3 = vld [vmem:[#allocation21_spill] sm:$0xff]  ;;  %s474_s29 = scalar_lea.vmem [#allocation14], %s936_s8  ;;  %s222_s8 = sadd.s32 1, %s936_s8  }
  0xc6   : > { %274 = vmatpush.bf16.msra.mxu0 %v571_v62  ;;  %335 = vmatpush.bf16.msra.mxu1 %v603_v63  ;;  %v559_v58 = vor.u32 %v1078_v27, %v1076_v26  ;;  %v591_v59 = vor.u32 %v1046_v11, %v1044_v10  ;;  %v627_v60 = vor.u32 %v1114_v45, %v1112_v44  ;;  %vm464_vm2 = vcmask 57344   ;;  %p219_p0 = scmp.ge.s32.totalorder %s222_s8, 8  }
  0xc7   : > { %399 = vmatpush.bf16.xpose.msra.mxu2 %v635_v53  ;;  %448 = vmatpush.bf16.msra.mxu3 %v635_v53  ;;  %v555_v62 = vor.u32 %v1074_v25, %v1072_v24  ;;  %v587_v63 = vor.u32 %v1042_v9, %v1040_v8  ;;  %v583_v53 = vor.u32 %v1038_v7, %v1036_v6  ;;  %s494_s1 = sshll.u32 (%p219_p0), %s1238_s10, 4  ;;  %s948_s13 = smov (%p219_p0), [#allocation12]   ;;  %s495_s1 = int_to_ptr.hbm [resolvable:$true] %s494_s1 }
  0xc8   :  { %s492_s14 = sshll.u32 (%p219_p0), %s948_s13, 4  ;;  %s949_s15 = smov (%p219_p0), [#allocation11]   ;;  %s493_s14 = int_to_ptr.vmem [resolvable:$true] %s492_s14 }
  0xc9   :  { %s481_s16 = sshll.u32 (%p219_p0), %s949_s15, 4  ;;  %s483_s5 = sshll.u32 (%p219_p0), %s1237_s9, 4  ;;  %s482_s16 = int_to_ptr.vmem [resolvable:$true] %s481_s16  ;;  %s484_s5 = int_to_ptr.hbm [resolvable:$true] %s483_s5 }
  0xca   : > { %275 = vmatpush.bf16.msra.mxu0 %v567_v0  ;;  %336 = vmatpush.bf16.msra.mxu1 %v599_v52  ;;  %v623_v0 = vor.u32 %v1110_v43, %v1108_v42  ;;  %v551_v52 = vor.u32 %v1070_v23, %v1068_v22  ;;  %s505_s21 = sshll.u32 (%p219_p0), %s1239_s11, 4  ;;  %s950_s0 = smov (%p219_p0), [#allocation14]   ;;  %s506_s21 = int_to_ptr.hbm [resolvable:$true] %s505_s21 }
  0xcb   : > { %449 = vmatpush.bf16.msra.mxu3 %v631_v57  ;;  %s503_s10 = sshll.u32 (%p219_p0), %s950_s0, 4  ;;  %s504_s10 = int_to_ptr.vmem [resolvable:$true] %s503_s10 }
  0xce   : > { %276 = vmatpush.bf16.msra.mxu0 %v563_v54  ;;  %337 = vmatpush.bf16.msra.mxu1 %v595_v56  ;;  %v619_v54 = vor.u32 %v1106_v41, %v1104_v40  ;;  %v547_v56 = vor.u32 %v1066_v21, %v1064_v20 }
  0xcf   : > { %400 = vmatpush.bf16.xpose.msra.mxu2 %v631_v57  ;;  %450 = vmatpush.bf16.msra.mxu3 %v627_v60  ;;  %v579_v57 = vor.u32 %v1245_v5, %v1244_v4 }
  0xd2   : > { %277 = vmatpush.bf16.msra.mxu0 %v559_v58  ;;  %338 = vmatpush.bf16.msra.mxu1 %v591_v59  ;;  %v615_v58 = vor.u32 %v1102_v39, %v1100_v38  ;;  %v543_v59 = vor.u32 %v1062_v19, %v1060_v18 }
  0xd3   : > { %451 = vmatpush.bf16.msra.mxu3 %v623_v0 }
  0xd6   : > { %278 = vmatpush.bf16.msra.mxu0 %v555_v62  ;;  %339 = vmatpush.bf16.msra.mxu1 %v587_v63  ;;  %v575_v62 = vor.u32 %v1247_v3, %v1246_v2  ;;  %v225_v63 = vpack.c.bf16 %v932_v61, %v932_v61 }
  0xd7   : > { %401 = vmatpush.bf16.xpose.msra.mxu2 %v627_v60  ;;  %452 = vmatpush.bf16.msra.mxu3 %v619_v54  ;;  %v607_v60 = vor.u32 %v1094_v35, %v1092_v34 }
  0xda   : > { %279 = vmatpush.bf16.msra.mxu0 %v551_v52  ;;  %340 = vmatpush.bf16.msra.mxu1 %v583_v53  ;;  %v611_v52 = vor.u32 %v1098_v37, %v1096_v36 }
  0xdb   : > { %453 = vmatpush.bf16.msra.mxu3 %v615_v58 }
  0xde   : > { %280 = vmatpush.bf16.msra.mxu0 %v547_v56  ;;  %341 = vmatpush.bf16.msra.mxu1 %v579_v57 }
  0xdf   : > { %402 = vmatpush.bf16.xpose.msra.mxu2 %v623_v0  ;;  %454 = vmatpush.bf16.msra.mxu3 %v611_v52 }
  0xe2   : > { %281 = vmatpush.bf16.msra.mxu0 %v543_v59  ;;  %342 = vmatpush.bf16.msra.mxu1 %v575_v62 }
  0xe3   : > { %455 = vmatpush.bf16.msra.mxu3 %v607_v60 }
  0xe5   : > { %282 = vmatmul.bf16.vlgmr.msra.gmra.mxu0 %v225_v63  ;;  %343 = vmatmul.bf16.vlgmr.msra.gmra.mxu1 %v928_v55 }
  0xe7   : > { %403 = vmatpush.bf16.xpose.msra.mxu2 %v619_v54 }
  0xef   : > { %404 = vmatpush.bf16.xpose.msra.mxu2 %v615_v58 }
  0xf7   : > { %405 = vmatpush.bf16.xpose.msra.mxu2 %v611_v52 }
  0xff   : > { %406 = vmatpush.bf16.xpose.msra.mxu2 %v607_v60 }
 0x162   : > { %v283_v53 = vpop.f32.mrf.mxu0  ;;  %v344_v56 = vpop.f32.mrf.mxu1 }
 0x163   : > { %v345_v61 = vadd.f32 %v344_v56, %v283_v53 }
 0x165   : > { %v348_v57 = vadd.f32 %v1127_v50, %v345_v61 }
 0x167   : > { %704 = vtanh.f32 %v348_v57 }
 0x16a   : > { %v285_v59 = vpop.f32.mrf.mxu0  ;;  %v346_v62 = vpop.f32.mrf.mxu1 }
 0x16d   : > { %v705_v61 = vpop.eup %704  }
 0x16e   : > { %v350_v0 = vpack.c.bf16 %v705_v61, %v705_v61 }
 0x170   : > { %407 = vmatmul.bf16.vlgmr.msra.gmra.mxu2 %v350_v0 }
 0x1f3   : > { %v408_v55 = vpop.f32.mrf.mxu2 }
 0x1f4   : > { %v409_v54 = vadd.f32 %v1132_v51, %v408_v55 }
 0x1f6   : > { %412 = vmax.xlane.f32.xlu0 %v409_v54 }
 0x1fb   : > { %v410_v58 = vpop.f32.mrf.mxu2 }
 0x269   : > { %v413_v63 = vpop.xlane.xlu0 %412 }
 0x26a   : > { %v414_v52 = vsub.f32 %v409_v54, %v413_v63  ;;  %vm428_vm0 = vcmp.ge.f32.partialorder %v409_v54, %v413_v63 }
 0x26b   : > { %v429_v60 = vsel %vm428_vm0, %v1026_v1, 128 }
 0x26c   : > { %v415_v2 = vmul.f32 1.442695, %v414_v52  ;;  %v431_v53 = vshra.s32 %v429_v60, 16  ;;  %v430_v62 = vand.u32 65535, %v429_v60 }
 0x26e   : > { %706 = vpow2.f32 %v415_v2  ;;  %v433_v56 = vcvt.s32.f32 %v431_v53  ;;  %v432_v3 = vcvt.s32.f32 %v430_v62 }
 0x270   : > { %434 = vmin.xlane.f32.xlu0 %v433_v56 }
 0x274   : > { %v707_v57 = vpop.eup %706 }
 0x275   : > { %v422_v59 = vmul.f32 %v707_v57, %v414_v52  ;;  %v947_v52 = vmov 1.0|1.0  }
 0x277   : > { %423 = vadd.xlane.f32.xlu2 %v422_v59 }
 0x2e3   : > { %v435_v0 = vpop.xlane.xlu0 %434 }
 0x2e4   : > { %vm436_vm1 = vcmp.eq.f32.partialorder %v433_v56, %v435_v0  ;;  %v441_v58 = vcvt.f32.s32 %v435_v0 }
 0x2e5   : > { %v437_v55 = vsel %vm436_vm1, %v432_v3, inf }
 0x2e6   : > { %438 = vmin.xlane.f32.xlu1 %v437_v55  ;;  %v442_v63 = vshll.u32 %v441_v58, 16 }
 0x2ea   : > { %v424_v56 = vpop.xlane.xlu2 %423 }
 0x2ee   : > { %417 = vadd.xlane.f32.xlu1 %v707_v57 }
 0x359   : > { %v439_v54 = vpop.xlane.xlu1 %438 }
 0x35a   : > { %v440_v4 = vcvt.f32.s32 %v439_v54 }
 0x35c   : > { %v443_v5 = vadd.s32 %v442_v63, %v440_v4 }
 0x35e   : > { %v462_v2 = vperm.slane %v443_v5, %v1026_v1  ;;  %vm444_vm3 = vcmp.eq.s32.totalorder %v1026_v1, %v443_v5 }
 0x35f   : > { %vm637_vm4 = vmpackc.low %vm444_vm3, %vm444_vm3 }
 0x360   : > { %465 = vst.msk [vmem:[%s463_s2] sm:$0x1] %vm464_vm2, %v462_v2  ;;  %638 = vmatmul.msk.bf16.vlgmr.msra.gmra.mxu3 %vm637_vm4, %v947_v52 }
 0x361   : > { %v418_v3 = vpop.xlane.xlu1 %417  ;;  %486 = dma.vmem_to_hbm [thread:$0]  (%p219_p0), %s482_s16, 128, %s484_s5, [#allocation4]  }
 0x362   : > { %708 = vlog2.f32 %v418_v3 }
 0x363   : > { %710 = vrcp.f32 %v418_v3 }
 0x368   : > { %v709_v60 = vpop.eup %708 }
 0x369   : > { %v711_v53 = vpop.eup %710  ;;  %v420_v4 = vmul.f32 0.6931472, %v709_v60 }
 0x36a   : > { %v425_v57 = vmul.f32 %v711_v53, %v424_v56 }
 0x36b   : > { %v427_v59 = vsub.f32 0.0, %v420_v4 }
 0x36c   : > { %v426_v62 = vsub.f32 %v420_v4, %v425_v57 }
 0x36d   : > { %v467_v5 = vperm.slane %v427_v59, %v1026_v1 }
 0x36e   : > { %v472_v0 = vperm.slane %v426_v62, %v1026_v1 }
 0x36f   : > { %470 = vst.msk [vmem:[%s469_s28] sm:$0x1] %vm464_vm2, %v467_v5 }
 0x370   : > { %475 = vst.msk [vmem:[%s474_s29] sm:$0x1] %vm464_vm2, %v472_v0  ;;  %497 = dma.vmem_to_hbm [thread:$0]  (%p219_p0), %s493_s14, 128, %s495_s1, [#allocation13]  }
 0x371   :  { %508 = dma.vmem_to_hbm [thread:$0]  (%p219_p0), %s504_s10, 128, %s506_s21, [#allocation13]  }
 0x3e3   : > { %v457_v55 = vpop.f32.mrf.mxu3 }
 0x3e4   : > { %v461_v55 = vpack.c.bf16 %v457_v55, %v457_v55  }
 0x3e7   :  { %221 = sbr.rel (!%p219_p0) target bundleno = 196 (0xc4), region = 102 }
 0x3eb   : > { %v459_v58 = vpop.f32.mrf.mxu3 }
 0x3ec   :  { %922 = dma.done.wait [#allocation4], 128  }
 0x3ed   :  { %923 = vsyncadd [#allocation4], 4294967168 }
 0x3ee   :  { %924 = dma.done.wait [#allocation13], 256  }
 0x3ef   :  { %925 = vsyncadd [#allocation13], 4294967040 }
 0x3f0   :  { %521 = vsyncpa [#allocation3], 1 }
 0x3f1   :  { %522 = vsyncpa [#allocation6], 1 }
 0x3f2   :  { %523 = vsyncpa [#allocation9], 1 }
 0x3f3   :  { %524 = vsyncpa [#allocation4], 1 }
 0x3f4   :  { %525 = vsyncpa [#allocation13], 1 }

</bundles_post_ra>
